<compile_context>
chip_gen: v6e
topology: v6e:2x2x1
jax: 0.10.0
libtpu: 0.0.40
codegen_flags: <defaults>
</compile_context>

<pallas_src>
import functools

import jax
import jax.numpy as jnp
from jax.experimental import pallas as pl
from jax.experimental.pallas import tpu as pltpu

LANE = 128


def _channel_attention_kernel(x_ref, w1_ref, w2_ref, o_ref, sum_s, max_s, *,
                              hw, hw_tile, chunk, need_mask):
    # x_ref : (1, C, HW_T)  current input tile
    # w1_ref: (Ch, C)       fc[0] weight (Conv2d(C, C//16, 1), squeezed)
    # w2_ref: (C, Ch)       fc[2] weight (Conv2d(C//16, C, 1), squeezed)
    # o_ref : (1, C, 1)     sigmoid channel attention for this batch element
    # sum_s : (C, chunk)    running per-lane partial sums   (f32 scratch)
    # max_s : (C, chunk)    running per-lane partial maxima (f32 scratch)
    h = pl.program_id(1)
    n_hw = pl.num_programs(1)

    @pl.when(h == 0)
    def _init():
        sum_s[...] = jnp.zeros_like(sum_s)
        max_s[...] = jnp.full_like(max_s, -jnp.inf)

    s_acc = sum_s[...]
    m_acc = max_s[...]
    c = s_acc.shape[0]
    n_chunks = hw_tile // chunk
    for k in range(n_chunks):
        blk = x_ref[0, :, k * chunk:(k + 1) * chunk].astype(jnp.float32)  # (C, chunk)
        if need_mask:
            # Mask out-of-range spatial positions of the (padded) last tile.
            limit = hw - h * hw_tile - k * chunk
            lane = jax.lax.broadcasted_iota(jnp.int32, (c, chunk), 1)
            valid = lane < limit
            s_blk = jnp.where(valid, blk, 0.0)
            m_blk = jnp.where(valid, blk, -jnp.inf)
        else:
            s_blk = blk
            m_blk = blk
        s_acc = s_acc + s_blk
        m_acc = jnp.maximum(m_acc, m_blk)
    sum_s[...] = s_acc
    max_s[...] = m_acc

    @pl.when(h == n_hw - 1)
    def _finalize():
        # Final cross-lane reductions (once per batch element).
        avg = jnp.sum(sum_s[...], axis=-1, keepdims=True) * (1.0 / float(hw))  # (C, 1)
        mx = jnp.max(max_s[...], axis=-1, keepdims=True)                        # (C, 1)
        pooled = jnp.concatenate([avg, mx], axis=1)                              # (C, 2)
        w1 = w1_ref[...].astype(jnp.float32)                                     # (Ch, C)
        w2 = w2_ref[...].astype(jnp.float32)                                     # (C, Ch)
        # Shared fc pass for both pooled descriptors (fused -> half the MXU ops).
        hid = jnp.dot(w1, pooled, preferred_element_type=jnp.float32)            # (Ch, 2)
        hid = jnp.maximum(hid, 0.0)                                              # ReLU
        out2 = jnp.dot(w2, hid, preferred_element_type=jnp.float32)              # (C, 2)
        att = out2[:, 0:1] + out2[:, 1:2]                                        # (C, 1)
        o_ref[...] = jax.nn.sigmoid(att)[None].astype(o_ref.dtype)               # (1, C, 1)


def _pick_hw_tile(c, hw, itemsize, vmem_budget_bytes=8 * 1024 * 1024):
    """Largest lane-aligned HW tile whose double-buffered tile fits the budget."""
    if hw < LANE:
        return hw                                    # full extent, single tile
    per_lane_bytes = 2 * c * itemsize                # x2 for double buffering
    max_lanes = max(LANE, (vmem_budget_bytes // per_lane_bytes) // LANE * LANE)
    hw_t = min((hw // LANE) * LANE, max_lanes, 4096)
    return max(LANE, hw_t)


def channel_attention(x, w1, w2, *, hw_tile=None):
    """x: (N, C, H, W); w1: (C//16, C) fc[0] weight; w2: (C, C//16) fc[2] weight."""
    N, C, H, W = x.shape
    Ch = w1.shape[0]
    assert w1.shape == (Ch, C) and w2.shape == (C, Ch)
    hw = H * W
    xr = x.reshape(N, C, hw)
    itemsize = jnp.dtype(x.dtype).itemsize
    if hw_tile is None:
        hw_tile = _pick_hw_tile(C, hw, itemsize)
    n_hw = pl.cdiv(hw, hw_tile)
    chunk = LANE if hw_tile % LANE == 0 else hw_tile
    need_mask = (hw % hw_tile) != 0

    kernel = functools.partial(
        _channel_attention_kernel,
        hw=hw, hw_tile=hw_tile, chunk=chunk, need_mask=need_mask)

    flops = 2 * N * C * hw + N * 2 * 2 * (2 * Ch * C)          # pooling + fused fc
    bytes_accessed = (xr.size * itemsize + (w1.size + w2.size) * 4
                      + N * C * itemsize)

    out = pl.pallas_call(
        kernel,
        out_shape=jax.ShapeDtypeStruct((N, C, 1), x.dtype),
        grid_spec=pltpu.PrefetchScalarGridSpec(
            num_scalar_prefetch=0,
            grid=(N, n_hw),
            in_specs=[
                pl.BlockSpec((1, C, hw_tile), lambda n, h: (n, 0, h)),
                pl.BlockSpec((Ch, C), lambda n, h: (0, 0)),   # resident weights
                pl.BlockSpec((C, Ch), lambda n, h: (0, 0)),
            ],
            out_specs=pl.BlockSpec((1, C, 1), lambda n, h: (n, 0, 0)),
            scratch_shapes=[
                pltpu.VMEM((C, chunk), jnp.float32),          # running sum
                pltpu.VMEM((C, chunk), jnp.float32),          # running max
            ],
        ),
        compiler_params=pltpu.CompilerParams(
            dimension_semantics=("parallel", "arbitrary")),
        cost_estimate=pl.CostEstimate(
            flops=flops, transcendentals=N * C, bytes_accessed=bytes_accessed),
    )(xr, w1, w2)
    return out.reshape(N, C, 1, 1)


def channel_attention_ref(x, w1, w2):
    """Pure-JAX reference mirroring the PyTorch module."""
    avg = jnp.mean(x, axis=(2, 3))                 # (N, C)
    mx = jnp.max(x, axis=(2, 3))                   # (N, C)

    def fc(v):
        h = jnp.maximum(v @ w1.T, 0.0)
        return h @ w2.T

    out = fc(avg) + fc(mx)
    return jax.nn.sigmoid(out)[:, :, None, None]


if __name__ == "__main__":
    # Note: the module hardcodes // 16 in fc regardless of `ratio`, so channels
    # must be a multiple of 16 for the PyTorch code to be valid.
    def run_case(N, C, H, W, key):
        Ch = C // 16
        kx, k1, k2 = jax.random.split(key, 3)
        x = jax.random.normal(kx, (N, C, H, W), dtype=jnp.float32)
        w1 = jax.random.normal(k1, (Ch, C), dtype=jnp.float32) * 0.1   # fc[0] weight
        w2 = jax.random.normal(k2, (C, Ch), dtype=jnp.float32) * 0.1   # fc[2] weight
        out = jax.block_until_ready(channel_attention(x, w1, w2))
        ref = jax.block_until_ready(channel_attention_ref(x, w1, w2))
        assert out.shape == (N, C, 1, 1), out.shape
        err = float(jnp.max(jnp.abs(out - ref)))
        assert jnp.allclose(out, ref, atol=1e-5, rtol=1e-5), err

    key = jax.random.PRNGKey(0)
    k_a, k_b = jax.random.split(key)
    run_case(2, 32, 16, 16, k_a)   # HW = 256: evenly tiled path
    run_case(2, 32, 20, 20, k_b)   # HW = 400: uneven tiling, masked tail tile
    print("KERNEL_OK")
</pallas_src>

<mosaic_0001>
module attributes {stable_mosaic.version = 11 : i64} {
  func.func @_channel_attention_kernel(%arg0: i32, %arg1: i32, %arg2: memref<1x32x256xf32, #tpu.memory_space<vmem>>, %arg3: memref<2x32xf32, #tpu.memory_space<vmem>>, %arg4: memref<32x2xf32, #tpu.memory_space<vmem>>, %arg5: memref<1x32x1xf32, #tpu.memory_space<vmem>>, %arg6: memref<32x128xf32, #tpu.memory_space<vmem>>, %arg7: memref<32x128xf32, #tpu.memory_space<vmem>>) attributes {dimension_semantics = [#tpu.dimension_semantics<parallel>, #tpu.dimension_semantics<arbitrary>], iteration_bounds = array<i64: 2, 1>, scalar_prefetch = 0 : i64, scratch_operands = 2 : i64, tpu.core_type = #tpu.core_type<tc>, window_params = [{transform_indices = @transform_0, window_bounds = array<i64: 1, 32, 256>}, {pipeline_mode = #tpu.pipeline_mode<synchronous>, transform_indices = @transform_1, window_bounds = array<i64: 2, 32>}, {pipeline_mode = #tpu.pipeline_mode<synchronous>, transform_indices = @transform_2, window_bounds = array<i64: 32, 2>}, {transform_indices = @transform_3, window_bounds = array<i64: 1, 32, 1>}]} {
    %c0_i32 = arith.constant 0 : i32
    %0 = arith.cmpi eq, %arg1, %c0_i32 : i32
    %1 = arith.extui %0 : i1 to i32
    %c0_i32_0 = arith.constant 0 : i32
    %2 = arith.cmpi ne, %1, %c0_i32_0 : i32
    scf.if %2 {
      %cst = arith.constant 0.000000e+00 : f32
      %18 = vector.broadcast %cst : f32 to vector<32x128xf32>
      %c0_15 = arith.constant 0 : index
      %c0_16 = arith.constant 0 : index
      %19 = vector.load %arg6[%c0_15, %c0_16] : memref<32x128xf32, #tpu.memory_space<vmem>>, vector<32x128xf32>
      tpu.vector_store %arg6[%c0_15, %c0_16], %18 {strides = array<i32>} : memref<32x128xf32, #tpu.memory_space<vmem>>, vector<32x128xf32>,
      %cst_17 = arith.constant 0xFF800000 : f32
      %20 = vector.broadcast %cst_17 : f32 to vector<32x128xf32>
      %c0_18 = arith.constant 0 : index
      %c0_19 = arith.constant 0 : index
      %21 = vector.load %arg7[%c0_18, %c0_19] : memref<32x128xf32, #tpu.memory_space<vmem>>, vector<32x128xf32>
      tpu.vector_store %arg7[%c0_18, %c0_19], %20 {strides = array<i32>} : memref<32x128xf32, #tpu.memory_space<vmem>>, vector<32x128xf32>,
    } else {
    }
    %c0 = arith.constant 0 : index
    %c0_1 = arith.constant 0 : index
    %3 = vector.load %arg6[%c0, %c0_1] : memref<32x128xf32, #tpu.memory_space<vmem>>, vector<32x128xf32>
    %c0_2 = arith.constant 0 : index
    %c0_3 = arith.constant 0 : index
    %4 = vector.load %arg7[%c0_2, %c0_3] : memref<32x128xf32, #tpu.memory_space<vmem>>, vector<32x128xf32>
    %c0_4 = arith.constant 0 : index
    %c0_5 = arith.constant 0 : index
    %c0_6 = arith.constant 0 : index
    %5 = vector.load %arg2[%c0_4, %c0_5, %c0_6] : memref<1x32x256xf32, #tpu.memory_space<vmem>>, vector<1x32x128xf32>
    %6 = vector.shape_cast %5 : vector<1x32x128xf32> to vector<32x128xf32>
    %7 = arith.addf %3, %6 : vector<32x128xf32>
    %8 = arith.maximumf %4, %6 : vector<32x128xf32>
    %c0_7 = arith.constant 0 : index
    %c0_8 = arith.constant 0 : index
    %c128 = arith.constant 128 : index
    %9 = vector.load %arg2[%c0_7, %c0_8, %c128] : memref<1x32x256xf32, #tpu.memory_space<vmem>>, vector<1x32x128xf32>
    %10 = vector.shape_cast %9 : vector<1x32x128xf32> to vector<32x128xf32>
    %11 = arith.addf %7, %10 : vector<32x128xf32>
    %12 = arith.maximumf %8, %10 : vector<32x128xf32>
    %c0_9 = arith.constant 0 : index
    %c0_10 = arith.constant 0 : index
    %13 = vector.load %arg6[%c0_9, %c0_10] : memref<32x128xf32, #tpu.memory_space<vmem>>, vector<32x128xf32>
    tpu.vector_store %arg6[%c0_9, %c0_10], %11 {strides = array<i32>} : memref<32x128xf32, #tpu.memory_space<vmem>>, vector<32x128xf32>,
    %c0_11 = arith.constant 0 : index
    %c0_12 = arith.constant 0 : index
    %14 = vector.load %arg7[%c0_11, %c0_12] : memref<32x128xf32, #tpu.memory_space<vmem>>, vector<32x128xf32>
    tpu.vector_store %arg7[%c0_11, %c0_12], %12 {strides = array<i32>} : memref<32x128xf32, #tpu.memory_space<vmem>>, vector<32x128xf32>,
    %c0_i32_13 = arith.constant 0 : i32
    %15 = arith.cmpi eq, %arg1, %c0_i32_13 : i32
    %16 = arith.extui %15 : i1 to i32
    %c0_i32_14 = arith.constant 0 : i32
    %17 = arith.cmpi ne, %16, %c0_i32_14 : i32
    scf.if %17 {
      %c0_15 = arith.constant 0 : index
      %c0_16 = arith.constant 0 : index
      %18 = vector.load %arg6[%c0_15, %c0_16] : memref<32x128xf32, #tpu.memory_space<vmem>>, vector<32x128xf32>
      %cst = arith.constant dense<0.000000e+00> : vector<32xf32>
      %19 = vector.multi_reduction <add>, %18, %cst [1] : vector<32x128xf32> to vector<32xf32>
      %20 = vector.shape_cast %19 : vector<32xf32> to vector<32x1xf32>
      %cst_17 = arith.constant 3.906250e-03 : f32
      %21 = vector.broadcast %cst_17 : f32 to vector<32x1xf32>
      %22 = arith.mulf %20, %21 : vector<32x1xf32>
      %c0_18 = arith.constant 0 : index
      %c0_19 = arith.constant 0 : index
      %23 = vector.load %arg7[%c0_18, %c0_19] : memref<32x128xf32, #tpu.memory_space<vmem>>, vector<32x128xf32>
      %cst_20 = arith.constant dense<0xFF800000> : vector<32xf32>
      %24 = vector.multi_reduction <maximumf>, %23, %cst_20 [1] : vector<32x128xf32> to vector<32xf32>
      %25 = vector.shape_cast %24 : vector<32xf32> to vector<32x1xf32>
      %26 = tpu.concatenate %22, %25 in 1 : vector<32x1xf32>, vector<32x1xf32> -> vector<32x2xf32>
      %c0_21 = arith.constant 0 : index
      %c0_22 = arith.constant 0 : index
      %27 = vector.load %arg3[%c0_21, %c0_22] : memref<2x32xf32, #tpu.memory_space<vmem>>, vector<2x32xf32>
      %c0_23 = arith.constant 0 : index
      %c0_24 = arith.constant 0 : index
      %28 = vector.load %arg4[%c0_23, %c0_24] : memref<32x2xf32, #tpu.memory_space<vmem>>, vector<32x2xf32>
      %cst_25 = arith.constant dense<0.000000e+00> : vector<2x2xf32>
      %29 = tpu.matmul %27, %26, %cst_25 {dimension_numbers = #tpu.dot_dimension_numbers<[1], [0], [0], [1], [0, 0, 1, 1], [], []>} : vector<2x32xf32>, vector<32x2xf32>, vector<2x2xf32> -> vector<2x2xf32>
      %cst_26 = arith.constant 0.000000e+00 : f32
      %30 = vector.broadcast %cst_26 : f32 to vector<2x2xf32>
      %31 = arith.maximumf %29, %30 : vector<2x2xf32>
      %cst_27 = arith.constant dense<0.000000e+00> : vector<32x2xf32>
      %32 = tpu.matmul %28, %31, %cst_27 {dimension_numbers = #tpu.dot_dimension_numbers<[1], [0], [0], [1], [0, 0, 1, 1], [], []>} : vector<32x2xf32>, vector<2x2xf32>, vector<32x2xf32> -> vector<32x2xf32>
      %33 = vector.extract_strided_slice %32 {offsets = [0, 0], sizes = [32, 1], strides = [1, 1]} : vector<32x2xf32> to vector<32x1xf32>
      %34 = vector.extract_strided_slice %32 {offsets = [0, 1], sizes = [32, 1], strides = [1, 1]} : vector<32x2xf32> to vector<32x1xf32>
      %35 = arith.addf %33, %34 : vector<32x1xf32>
      %36 = arith.negf %35 : vector<32x1xf32>
      %37 = math.exp %36 : vector<32x1xf32>
      %cst_28 = arith.constant 1.000000e+00 : f32
      %38 = vector.broadcast %cst_28 : f32 to vector<32x1xf32>
      %39 = arith.addf %38, %37 : vector<32x1xf32>
      %40 = arith.divf %38, %39 : vector<32x1xf32>
      %41 = vector.shape_cast %40 : vector<32x1xf32> to vector<1x32x1xf32>
      %c0_29 = arith.constant 0 : index
      %c0_30 = arith.constant 0 : index
      %c0_31 = arith.constant 0 : index
      %42 = vector.load %arg5[%c0_29, %c0_30, %c0_31] : memref<1x32x1xf32, #tpu.memory_space<vmem>>, vector<1x32x1xf32>
      tpu.vector_store %arg5[%c0_29, %c0_30, %c0_31], %41 {strides = array<i32>} : memref<1x32x1xf32, #tpu.memory_space<vmem>>, vector<1x32x1xf32>,
    } else {
    }
    return
  }
  func.func @transform_0(%arg0: i32, %arg1: i32) -> (i32, i32, i32) {
    %c0_i32 = arith.constant 0 : i32
    %c0_i32_0 = arith.constant 0 : i32
    return %arg0, %c0_i32, %arg1 : i32, i32, i32
  }
  func.func @transform_1(%arg0: i32, %arg1: i32) -> (i32, i32) {
    %c0_i32 = arith.constant 0 : i32
    %c0_i32_0 = arith.constant 0 : i32
    %c0_i32_1 = arith.constant 0 : i32
    return %c0_i32, %c0_i32_0 : i32, i32
  }
  func.func @transform_2(%arg0: i32, %arg1: i32) -> (i32, i32) {
    %c0_i32 = arith.constant 0 : i32
    %c0_i32_0 = arith.constant 0 : i32
    %c0_i32_1 = arith.constant 0 : i32
    return %c0_i32, %c0_i32_0 : i32, i32
  }
  func.func @transform_3(%arg0: i32, %arg1: i32) -> (i32, i32, i32) {
    %c0_i32 = arith.constant 0 : i32
    %c0_i32_0 = arith.constant 0 : i32
    %c0_i32_1 = arith.constant 0 : i32
    return %arg0, %c0_i32, %c0_i32_0 : i32, i32, i32
  }
}

</mosaic_0001>

<bundles_post_ra>
// kernel: tpu_custom_call.1
= control target key start
LH: loop header
LB: loop body
LE: loop exit
PB: predicated region body
PF: predicated region fallthrough
CT: control target
= control target key end

     0   :  { %8 = vsyncpa [#allocation5], 0  ;;  %s959_s0 = inlined_call_operand.hbm [shape: f32[2,32,256], index: 0, kind: input, shape index: {}]   ;;  %s960_s1 = inlined_call_operand.vmem [shape: f32[2,32], index: 1, kind: input, shape index: {}]   ;;  %s961_s2 = inlined_call_operand.vmem [shape: f32[32,2], index: 2, kind: input, shape index: {}]   ;;  %s962_s3 = inlined_call_operand.vmem [shape: f32[2,32,1], index: 3, kind: output, shape index: {}]  }
   0x1   :  { %10 = vsyncpa [#allocation5 + $0x1], 0  ;;  %s840_s12 = smov 0   ;;  %s842_s13 = smov 0  }
   0x2   :  { %s844_s14 = smov 0   ;;  %s846_s15 = smov 0  }
   0x3   :  { %s848_s16 = smov 0   ;;  %s850_s17 = smov 0  }
   0x4 LB: > { %s604_s18 = sadd.s32 4294967295, %s812_s17   ;;  %s28_s19 = sadd.s32 1, %s808_s16  ;;  %s812_s17 = sphi %s850_s17, %s16_s17   ;;  %s808_s16 = sphi %s848_s16, %s970_s16   ;;  %s804_s15 = sphi %s846_s15, %s969_s15   ;;  %s800_s14 = sphi %s844_s14, %s968_s14   ;;  %s796_s13 = sphi %s842_s13, %s967_s13   ;;  %s792_s12 = sphi %s840_s12, %s966_s12  }
   0x5   : > { %p30_p0 = scmp.ge.s32.totalorder %s28_s19, 2  ;;  %s37_s20 = sadd.s32 1, %s800_s14 }
   0x6   : > { %p44_p1 = scmp.ne.s32.totalorder %s800_s14, %s796_s13  ;;  %p45_p2 = scmp.eq.s32.totalorder %s812_s17, 0 }
   0x7   : > { %s972_s19 = smov (%p30_p0, %s28_s19), 0  ;;  %p50_p4 = scmp.ne.s32.totalorder %s796_s13, %s792_s12 }
   0x8   : > { %p876_p3 = por %p45_p2, %p44_p1  ;;  %s32_s22 = ssub.s32 %s808_s16, %s972_s19 }
   0x9   : > { %p51_p5 = scmp.eq.s32.totalorder %s604_s18, 0  ;;  %p35_p6 = scmp.eq.s32.totalorder %s32_s22, 0 }
   0xa   : > { %p664_p8 = scmp.lt.s32.totalorder %s812_s17, 2  ;;  %s148_s25 = sand.u32 1, %s800_s14  }
   0xb   : > { %p883_p7 = por %p51_p5, %p50_p4  ;;  %s627_s26 = sshll.u32 %s808_s16, 10 }
   0xc   : > { %s889_s24 = scalar_select %p35_p6, %s800_s14, %s37_s20  }
   0xd   : > { %s608_s27 = sshll.u32 %s148_s25, 6  ;;  %s160_s30 = scalar_lea.hbm %s959_s0, %s627_s26 }
   0xe   : > { %s152_s4 = scalar_lea.vmem [#allocation4], %s608_s27  ;;  %p898_p9 = pnand %p664_p8, %p876_p3 }
   0xf   : > { %s161_s5 = sshll.u32 %s152_s4, 4  ;;  %s149_s7 = scalar_lea.sflag [#allocation5], %s148_s25  ;;  %s162_s5 = int_to_ptr.vmem [resolvable:$true] %s161_s5 }
  0x10   : > { %p736_p10 = pneg %p898_p9  ;;  %s747_s8 = scalar_lea.vmem %s162_s5, 1024 }
  0x11   : > { %p748_p11 = scmp.ne.s32.totalorder %s162_s5, %s747_s8  ;;  %s814_s9 = smov [#allocation4]  }
  0x12   : > { %s752_s10 = sshll.u32 %s814_s9, 4  ;;  %s753_s10 = int_to_ptr.vmem [resolvable:$false] %s752_s10 }
  0x13   : > { %p750_p12 = pnand %p748_p11, %p736_p10  ;;  %s754_s11 = scalar_lea.vmem %s753_s10, 2048 }
  0x14   : > { %p755_p0 = scmp.lt.s32.totalorder %s162_s5, %s753_s10  ;;  %p756_p1 = scmp.lt.s32.totalorder %s754_s11, %s747_s8 }
  0x15   : > { %p751_p13 = pneg %p750_p12 }
  0x16   : > { %p757_p2 = por %p756_p1, %p755_p0 }
  0x18   : > { %p758_p3 = pnand %p757_p2, %p751_p13 }
  0x1a   : > { %761 = shalt.err (!%p758_p3)
}
  0x1b   : > { %s815_s12 = smov 256   ;;  %s816_s18 = smov 16  }
  0x1c   : > { %663 = dma.hbm_to_vmem [thread:$0]  (!%p898_p9), %s160_s30, 1024, %s162_s5, %s149_s7, %s815_s12, %s815_s12, %s816_s18  }
  0x1d   : > { %p611_p4 = scmp.ge.s32.totalorder %s812_s17, 1  ;;  %p169_p5 = scmp.lt.s32.totalorder %s812_s17, 3 }
  0x1f   : > { %p170_p6 = pnand %p611_p4, %p169_p5 }
  0x20   : > { %s175_s20 = sand.u32 (!%p170_p6), 1, %s796_s13  }
  0x21   : > { %173 = sbr.rel (%p170_p6) target bundleno = 746 (0x2ea), region = 32  ;;  %s612_s21 = sshll.u32 (!%p170_p6), %s175_s20, 6 }
  0x22   : > { %s176_s22 = scalar_lea.sflag (!%p170_p6), [#allocation5], %s175_s20  ;;  %s179_s25 = scalar_lea.vmem (!%p170_p6), [#allocation4], %s612_s21 }
  0x26   : > { %787 = dma.done.wait (%p883_p7), %s176_s22, 1024  }
  0x27   : > { %789 = vsyncadd (%p883_p7), %s176_s22, 4294966272  ;;  %v231_v0 = vld [vmem:[%s179_s25 + $0x30] sm:$0xff]  ;;  %v243_v1 = vld [vmem:[%s179_s25 + $0x38] sm:$0xff]  ;;  %v817_v16 = vmov 0.0   ;;  %vm818_vm0 = vmmov 0   ;;  %vm291_vm1 = vcmask 7168  }
  0x28   : > { %v230_v2 = vld [vmem:[%s179_s25 + $0x20] sm:$0xff]  ;;  %v251_v3 = vmax.f32 %v231_v0, %v243_v1  ;;  %v247_v4 = vadd.f32 %v243_v1, %v231_v0  ;;  %v242_v5 = vld [vmem:[%s179_s25 + $0x28] sm:$0xff]  ;;  %v229_v6 = vld [vmem:[%s179_s25 + $0x10] sm:$0xff]  ;;  %639 = vmatprep.subr.mxu0 %v817_v16  ;;  %647 = vmatprep.mubr.msk.f32.mxu0 %vm818_vm0, %v817_v16  ;;  %vm301_vm2 = vcmask 261120   ;;  %vm376_vm3 = vcmask 15360   ;;  %s819_s8 = smov 127  }
  0x29   : > { %v241_v7 = vld [vmem:[%s179_s25 + $0x18] sm:$0xff]  ;;  %v246_v8 = vadd.f32 %v242_v5, %v230_v2  ;;  %v228_v10 = vld [vmem:[%s179_s25] sm:$0xff]  ;;  %v240_v11 = vld [vmem:[%s179_s25 + $0x8] sm:$0xff]  ;;  %v250_v12 = vmax.f32 %v230_v2, %v242_v5  ;;  %vm389_vm4 = vcmask 1041408   ;;  %p203_p7 = scmp.lt.s32.totalorder %s804_s15, 1 }
  0x2a   : > { %289 = vmax.xlane.f32.xlu1 %v251_v3  ;;  %273 = vadd.xlane.f32.xlu0 %v247_v4  ;;  %v245_v9 = vadd.f32 %v241_v7, %v229_v6  ;;  %v244_v13 = vadd.f32 %v240_v11, %v228_v10  ;;  %v249_v14 = vmax.f32 %v229_v6, %v241_v7  ;;  %v296_v32 = vld [vmem:[%s960_s1] sm:$0x3]  ;;  %v298_v38 = vld [vmem:[%s961_s2 + $0x8] sm:$0xff]  ;;  %v299_v39 = vld [vmem:[%s961_s2 + $0x10] sm:$0xff] }
  0x2b   : > { %v248_v15 = vmax.f32 %v228_v10, %v240_v11  ;;  %v297_v34 = vld [vmem:[%s961_s2] sm:$0xff]  ;;  %v300_v40 = vld [vmem:[%s961_s2 + $0x18] sm:$0xff]  ;;  %s974_s15 = smov (!%p203_p7, %s804_s15), 1 }
  0x2c   : > { %652 = vmatprep.mubr.msk.f32.mxu1 %vm376_vm3, %v297_v34  ;;  %s628_s9 = sshll.u32 %s974_s15, 5 }
  0x2d   : > { %s207_s12 = scalar_lea.vmem %s962_s3, %s628_s9 }
  0x2e   : > { %271 = vadd.xlane.f32.xlu0 %v246_v8  ;;  %269 = vadd.xlane.f32.xlu1 %v245_v9 }
  0x32   : > { %287 = vmax.xlane.f32.xlu0 %v250_v12  ;;  %267 = vadd.xlane.f32.xlu1 %v244_v13 }
  0x36   : > { %285 = vmax.xlane.f32.xlu0 %v249_v14  ;;  %283 = vmax.xlane.f32.xlu1 %v248_v15 }
  0xb3   : > { %v290_v17 = vpop.xlane.xlu1 %289  ;;  %v274_v18 = vpop.xlane.xlu0 %273 }
  0xb4   : > { %v278_v19 = vmul.f32 0.00390625, %v274_v18 }
  0xb6   : > { %v295_v20 = vsel %vm291_vm1, %v278_v19, %v290_v17 }
  0xb7   : > { %640 = vmatpush3.msra.mxu0 %v295_v20  ;;  %v272_v21 = vpop.xlane.xlu0 %271  ;;  %v270_v22 = vpop.xlane.xlu1 %269 }
  0xb8   : > { %641 = vmatprep.subr.mxu0 %v817_v16  ;;  %v277_v23 = vmul.f32 0.00390625, %v272_v21  ;;  %v276_v27 = vmul.f32 0.00390625, %v270_v22 }
  0xbb   : > { %v288_v24 = vpop.xlane.xlu0 %287  ;;  %v268_v25 = vpop.xlane.xlu1 %267 }
  0xbc   : > { %v294_v26 = vsel %vm291_vm1, %v277_v23, %v288_v24  ;;  %v275_v28 = vmul.f32 0.00390625, %v268_v25 }
  0xbd   : > { %642 = vmatpush3.msra.mxu0 %v294_v26 }
  0xbe   : > { %643 = vmatprep.subr.mxu0 %v817_v16 }
  0xbf   : > { %v286_v29 = vpop.xlane.xlu0 %285  ;;  %v284_v30 = vpop.xlane.xlu1 %283 }
  0xc0   : > { %v293_v31 = vsel %vm291_vm1, %v276_v27, %v286_v29  ;;  %v292_v33 = vsel %vm291_vm1, %v275_v28, %v284_v30 }
  0xc1   : > { %644 = vmatpush3.msra.mxu0 %v293_v31 }
  0xc2   : > { %645 = vmatprep.subr.mxu0 %v817_v16 }
  0xc3   : > { %646 = vmatpush3.msra.mxu0 %v292_v33 }
  0xc4   : > { %648 = vmatmul.mubr.msk.f32.vlgmr.msra.gmra.mxu0 %vm301_vm2, %v296_v32 }
 0x184   : > { %v371_v35 = vpop.f32.mrf.mxu0 }
 0x185   : > { %v375_v36 = vmax.f32 %v371_v35, 0.0 }
 0x186   : > { %v649_v37 = vpop.f32.mrf.mxu0 }
 0x187   : > { %650 = vmatprep.subr.msk.mxu1 %vm389_vm4, %v375_v36 }
 0x188   : > { %651 = vmatpush3.msk.msra.mxu1 %vm389_vm4, %v375_v36 }
 0x189   : > { %653 = vmatmul.mubr.msk.f32.vlgmr.msra.gmra.mxu1 %vm376_vm3, %v298_v38 }
 0x18a   : > { %655 = vmatprep.mubr.msk.f32.mxu1 %vm376_vm3, %v299_v39 }
 0x18d   : > { %656 = vmatmul.mubr.msk.f32.gmra.mxu1 %vm376_vm3, %v300_v40 }
 0x249   : > { %v654_v41 = vpop.f32.mrf.mxu1 }
 0x24a   : > { %484 = vrot.lane.b32.xlu1 %v654_v41, %s819_s8 }
 0x24b   : > { %v459_v42 = vpop.f32.mrf.mxu1 }
 0x24c   : > { %482 = vrot.lane.b32.xlu0 %v459_v42, %s819_s8 }
 0x24d   : > { %v657_v43 = vpop.f32.mrf.mxu1 }
 0x24f   : > { %v469_v44 = vpop.f32.mrf.mxu1 }
 0x250   : > { %486 = vrot.lane.b32.xlu1 %v469_v44, %s819_s8 }
 0x254   : > { %488 = vrot.lane.b32.xlu1 %v657_v43, %s819_s8 }
 0x2bc   : > { %v485_v45 = vpop.permute.xlu1 %484 }
 0x2bd   : > { %v495_v46 = vadd.f32 %v654_v41, %v485_v45 }
 0x2be   : > { %v483_v47 = vpop.permute.xlu0 %482 }
 0x2bf   : > { %v622_v48 = vmul.f32 -1.442695, %v495_v46  ;;  %v494_v49 = vadd.f32 %v483_v47, %v459_v42 }
 0x2c1   : > { %718 = vpow2.f32 %v622_v48  ;;  %v621_v50 = vmul.f32 -1.442695, %v494_v49 }
 0x2c2   : > { %v487_v51 = vpop.permute.xlu1 %486 }
 0x2c3   : > { %720 = vpow2.f32 %v621_v50  ;;  %v496_v52 = vadd.f32 %v487_v51, %v469_v44 }
 0x2c5   : > { %v623_v53 = vmul.f32 -1.442695, %v496_v52 }
 0x2c6   : > { %v489_v54 = vpop.permute.xlu1 %488 }
 0x2c7   : > { %722 = vpow2.f32 %v623_v53  ;;  %v497_v55 = vadd.f32 %v657_v43, %v489_v54 }
 0x2c9   : > { %v624_v56 = vmul.f32 -1.442695, %v497_v55 }
 0x2cb   : > { %724 = vpow2.f32 %v624_v56 }
 0x2ce   : > { %v719_v57 = vpop.eup %718 }
 0x2cf   : > { %v511_v58 = vadd.f32 1.0, %v719_v57 }
 0x2d0   : > { %v721_v59 = vpop.eup %720 }
 0x2d1   : > { %726 = vrcp.f32 %v511_v58  ;;  %v510_v60 = vadd.f32 1.0, %v721_v59 }
 0x2d3   : > { %728 = vrcp.f32 %v510_v60 }
 0x2d4   : > { %v723_v61 = vpop.eup %722 }
 0x2d5   : > { %v512_v62 = vadd.f32 1.0, %v723_v61 }
 0x2d7   : > { %730 = vrcp.f32 %v512_v62 }
 0x2d8   : > { %v725_v63 = vpop.eup %724 }
 0x2d9   : > { %v513_v0 = vadd.f32 1.0, %v725_v63 }
 0x2db   : > { %732 = vrcp.f32 %v513_v0 }
 0x2de   : > { %v727_v1 = vpop.eup %726 }
 0x2df   : > { %523 = vst.msk [vmem:[%s207_s12 + $0x8] sm:$0xff] %vm291_vm1, %v727_v1 }
 0x2e0   : > { %v729_v2 = vpop.eup %728 }
 0x2e1   : > { %522 = vst.msk [vmem:[%s207_s12] sm:$0xff] %vm291_vm1, %v729_v2 }
 0x2e4   : > { %v731_v3 = vpop.eup %730 }
 0x2e5   : > { %524 = vst.msk [vmem:[%s207_s12 + $0x10] sm:$0xff] %vm291_vm1, %v731_v3 }
 0x2e8   : > { %v733_v4 = vpop.eup %732 }
 0x2e9   : > { %525 = vst.msk [vmem:[%s207_s12 + $0x18] sm:$0xff] %vm291_vm1, %v733_v4 }
 0x2ea PF: > { %s16_s17 = sadd.s32 1, %s812_s17   ;;  %s966_s12 = smov %s796_s13 }
 0x2eb   : > { %p13_p8 = scmp.ge.s32.totalorder %s16_s17, 4   ;;  %s967_s13 = smov %s800_s14 }
 0x2ec   : > { %s968_s14 = smov %s889_s24  ;;  %s969_s15 = smov %s808_s16 }
 0x2ed   : > { %s970_s16 = smov %s972_s19  ;;  %15 = sbr.rel (!%p13_p8) target bundleno = 4 (0x4), region = 80 }
 0x2f2   :  { %547 = vsyncpa [#allocation5], 1 }
 0x2f3   :  { %549 = vsyncpa [#allocation5 + $0x1], 1 }

</bundles_post_ra>
